<compile_context>
chip_gen: v6e
topology: v6e:2x2x1
jax: 0.10.0
libtpu: 0.0.40
codegen_flags: <defaults>
</compile_context>

<pallas_src>
import jax
import jax.numpy as jnp
from jax import lax
from jax.experimental import pallas as pl
from jax.experimental.pallas import tpu as pltpu


_NEG_BIG = -1e30  # finite "-inf": 0 * _NEG_BIG == 0.0, so the one-hot matmul never NaNs


def _round_up(x, m):
    return (x + m - 1) // m * m


def _gather_logits(idx_ref, table_ref, tile_n, v_pad):
    """Embedding lookup as an exact 0/1 one-hot matmul on the MXU."""
    cols = lax.broadcasted_iota(jnp.int32, (tile_n, v_pad), 1)
    onehot = (cols == idx_ref[...]).astype(table_ref.dtype)          # (tile_n, v_pad)
    logits = jnp.dot(onehot, table_ref[...],
                     preferred_element_type=jnp.float32)             # (tile_n, v_pad)
    return cols, logits


def _make_train_kernel(n_true, with_logits):
    """Embedding gather + per-tile cross-entropy partial sums (no cross-step state)."""

    def kernel(idx_ref, tgt_ref, table_ref, *out_refs):
        if with_logits:
            logits_ref, loss_ref = out_refs
            tile_n, v_pad = logits_ref.shape
        else:
            (loss_ref,) = out_refs
            tile_n = idx_ref.shape[0]
            v_pad = table_ref.shape[1]

        i = pl.program_id(0)
        cols, logits = _gather_logits(idx_ref, table_ref, tile_n, v_pad)
        if with_logits:
            logits_ref[...] = logits

        # Padded vocab lanes already hold -1e30 (column padding of the table),
        # so logsumexp needs no extra masking work here.
        m = jnp.max(logits, axis=-1, keepdims=True)                   # (tile_n, 1)
        lse = m + jnp.log(jnp.sum(jnp.exp(logits - m), axis=-1, keepdims=True))
        picked = jnp.sum(jnp.where(cols == tgt_ref[...], logits, 0.0),
                         axis=-1, keepdims=True)                      # (tile_n, 1)

        # Rows beyond the true N (grid padding) contribute zero to this tile's sum.
        rows = i * tile_n + lax.broadcasted_iota(jnp.int32, (tile_n, 1), 0)
        per_row = jnp.where(rows < n_true, lse - picked, 0.0)
        loss_ref[...] = jnp.sum(per_row, axis=0, keepdims=True).reshape(1, 1, 1)

    return kernel


def _infer_kernel(idx_ref, table_ref, logits_ref):
    """Inference-only kernel: embedding gather, no cross-entropy work."""
    tile_n, v_pad = logits_ref.shape
    _, logits = _gather_logits(idx_ref, table_ref, tile_n, v_pad)
    logits_ref[...] = logits


def bigram_forward(table, idx, targets=None, *, tile_n=None, return_logits=True):
    """Mirrors BigramLanguageModel.forward.

    Returns (logits, loss):
      - targets is None:  logits (B, T, V), loss None
      - targets given:    logits (B*T, V),  loss scalar (mean cross-entropy)
      - targets given and return_logits=False: (None, loss)  [skips logits writeback]
    """
    B, T = idx.shape
    V = table.shape[0]
    N = B * T

    V_pad = _round_up(V, 128)                          # lane-dense logits
    if tile_n is None:
        tile_n = 1024 if N >= 8192 else 512            # writeback/overhead bound -> big tiles
    tile_n = _round_up(max(8, min(int(tile_n), _round_up(N, 8))), 8)
    N_pad = _round_up(N, tile_n)
    num_tiles = N_pad // tile_n

    # Column padding -1e30 (finite) so one-hot @ table yields -1e30 in padded lanes;
    # row padding 0 (idx < V guarantees padded rows are never selected).
    table_pad = table.astype(jnp.float32)
    table_pad = jnp.pad(table_pad, ((0, 0), (0, V_pad - V)), constant_values=_NEG_BIG)
    table_pad = jnp.pad(table_pad, ((0, V_pad - V), (0, 0)))
    idx_flat = jnp.pad(idx.reshape(N).astype(jnp.int32),
                       (0, N_pad - N)).reshape(N_pad, 1)

    idx_spec = pl.BlockSpec((tile_n, 1), lambda i: (i, 0))
    tgt_spec = pl.BlockSpec((tile_n, 1), lambda i: (i, 0))
    logits_spec = pl.BlockSpec((tile_n, V_pad), lambda i: (i, 0))
    loss_spec = pl.BlockSpec((1, 1, 1), lambda i: (i, 0, 0))

    # Grid-invariant table block: skip the default double buffering once the table
    # is big enough for the second copy to matter (hits v7x's 64 MiB VMEM first).
    table_bytes = V_pad * V_pad * 4
    single_buffer_table = table_bytes >= (2 << 20)
    if single_buffer_table:
        table_spec = pl.BlockSpec((V_pad, V_pad), lambda i: (0, 0),
                                  pipeline_mode=pl.Buffered(1))
    else:
        table_spec = pl.BlockSpec((V_pad, V_pad), lambda i: (0, 0))

    # VMEM budget: table buffer(s) + double-buffered logits tile + live f32
    # intermediates + Mosaic internal scratch headroom; cap at 48 MiB (v7x-safe).
    tile_bytes = tile_n * V_pad * 4
    vmem_limit = int(min(max((1 if single_buffer_table else 2) * table_bytes
                             + 2 * tile_bytes
                             + 4 * tile_bytes
                             + (4 << 20),
                             16 << 20),
                         48 << 20))

    compiler_params = pltpu.CompilerParams(
        dimension_semantics=("parallel",),   # per-tile-independent outputs -> megacore-shardable
        vmem_limit_bytes=vmem_limit,
    )

    if targets is None:
        logits_pad = pl.pallas_call(
            _infer_kernel,
            out_shape=jax.ShapeDtypeStruct((N_pad, V_pad), jnp.float32),
            grid_spec=pltpu.PrefetchScalarGridSpec(
                num_scalar_prefetch=0,
                grid=(num_tiles,),
                in_specs=[idx_spec, table_spec],
                out_specs=logits_spec,
            ),
            compiler_params=compiler_params,
        )(idx_flat, table_pad)
        return logits_pad[:N, :V].reshape(B, T, V), None

    tgt_flat = jnp.pad(targets.reshape(N).astype(jnp.int32),
                       (0, N_pad - N)).reshape(N_pad, 1)
    kernel = _make_train_kernel(N, return_logits)

    if return_logits:
        out_shape = (jax.ShapeDtypeStruct((N_pad, V_pad), jnp.float32),
                     jax.ShapeDtypeStruct((num_tiles, 1, 1), jnp.float32))
        out_specs = (logits_spec, loss_spec)
    else:
        out_shape = jax.ShapeDtypeStruct((num_tiles, 1, 1), jnp.float32)
        out_specs = loss_spec

    out = pl.pallas_call(
        kernel,
        out_shape=out_shape,
        grid_spec=pltpu.PrefetchScalarGridSpec(
            num_scalar_prefetch=0,
            grid=(num_tiles,),
            in_specs=[idx_spec, tgt_spec, table_spec],
            out_specs=out_specs,
        ),
        compiler_params=compiler_params,
    )(idx_flat, tgt_flat, table_pad)

    if return_logits:
        logits_pad, partial = out
    else:
        logits_pad, partial = None, out

    loss = jnp.sum(partial) / jnp.float32(N)
    if return_logits:
        return logits_pad[:N, :V], loss
    return None, loss


def _reference_forward(table, idx, targets):
    # Pure-JAX reference of the PyTorch semantics, for a quiet sanity check.
    logits = table[idx]                                        # (B, T, V)
    B, T, V = logits.shape
    logits = logits.reshape(B * T, V)
    t = targets.reshape(B * T)
    lse = jax.nn.logsumexp(logits, axis=-1)
    picked = jnp.take_along_axis(logits, t[:, None], axis=-1)[:, 0]
    return logits, jnp.mean(lse - picked)


if __name__ == "__main__":
    vocab_size = 65   # e.g. tiny-shakespeare character vocabulary
    B, T = 2, 8

    key = jax.random.PRNGKey(0)
    k_table, k_idx, k_tgt = jax.random.split(key, 3)

    # nn.Embedding default init: N(0, 1)
    table = jax.random.normal(k_table, (vocab_size, vocab_size), dtype=jnp.float32)
    idx = jax.random.randint(k_idx, (B, T), 0, vocab_size, dtype=jnp.int32)
    targets = jax.random.randint(k_tgt, (B, T), 0, vocab_size, dtype=jnp.int32)

    # Training-style call (with targets).
    logits, loss = bigram_forward(table, idx, targets)
    logits = jax.block_until_ready(logits)
    loss = jax.block_until_ready(loss)

    # Loss-only training call (skips logits HBM writeback).
    _, loss_only = bigram_forward(table, idx, targets, return_logits=False)
    loss_only = jax.block_until_ready(loss_only)

    # Inference-style call (targets=None) -> (B, T, V) logits, loss None.
    logits_inf, loss_none = bigram_forward(table, idx, None)
    logits_inf = jax.block_until_ready(logits_inf)
    assert loss_none is None
    assert logits_inf.shape == (B, T, vocab_size)

    # Quiet correctness check against pure-JAX reference.
    ref_logits, ref_loss = _reference_forward(table, idx, targets)
    assert logits.shape == (B * T, vocab_size)
    assert jnp.allclose(logits, ref_logits, atol=1e-5)
    assert jnp.allclose(logits_inf.reshape(B * T, vocab_size), ref_logits, atol=1e-5)
    assert jnp.allclose(loss, ref_loss, atol=1e-5)
    assert jnp.allclose(loss_only, ref_loss, atol=1e-5)

    print("KERNEL_OK")
</pallas_src>

<mosaic_0001>
module attributes {stable_mosaic.version = 11 : i64} {
  func.func @kernel(%arg0: i32, %arg1: memref<16x1xi32, #tpu.memory_space<vmem>>, %arg2: memref<16x1xi32, #tpu.memory_space<vmem>>, %arg3: memref<128x128xf32, #tpu.memory_space<vmem>>, %arg4: memref<16x128xf32, #tpu.memory_space<vmem>>, %arg5: memref<1x1x1xf32, #tpu.memory_space<vmem>>) attributes {dimension_semantics = [#tpu.dimension_semantics<parallel>], iteration_bounds = array<i64: 1>, scalar_prefetch = 0 : i64, scratch_operands = 0 : i64, tpu.core_type = #tpu.core_type<tc>, window_params = [{transform_indices = @transform_0, window_bounds = array<i64: 16, 1>}, {transform_indices = @transform_1, window_bounds = array<i64: 16, 1>}, {pipeline_mode = #tpu.pipeline_mode<synchronous>, transform_indices = @transform_2, window_bounds = array<i64: 128, 128>}, {transform_indices = @transform_3, window_bounds = array<i64: 16, 128>}, {transform_indices = @transform_4, window_bounds = array<i64: 1, 1, 1>}]} {
    %0 = tpu.iota {dimensions = array<i32: 1>} : vector<16x128xi32>
    %c0 = arith.constant 0 : index
    %c0_0 = arith.constant 0 : index
    %1 = vector.load %arg1[%c0, %c0_0] : memref<16x1xi32, #tpu.memory_space<vmem>>, vector<16x1xi32>
    %2 = vector.broadcast %1 : vector<16x1xi32> to vector<16x128xi32>
    %3 = arith.cmpi eq, %0, %2 : vector<16x128xi32>
    %4 = arith.extui %3 : vector<16x128xi1> to vector<16x128xi32>
    %5 = arith.sitofp %4 : vector<16x128xi32> to vector<16x128xf32>
    %c0_1 = arith.constant 0 : index
    %c0_2 = arith.constant 0 : index
    %6 = vector.load %arg3[%c0_1, %c0_2] : memref<128x128xf32, #tpu.memory_space<vmem>>, vector<128x128xf32>
    %cst = arith.constant dense<0.000000e+00> : vector<16x128xf32>
    %7 = tpu.matmul %5, %6, %cst {dimension_numbers = #tpu.dot_dimension_numbers<[1], [0], [0], [1], [0, 0, 1, 1], [], []>} : vector<16x128xf32>, vector<128x128xf32>, vector<16x128xf32> -> vector<16x128xf32>
    %c0_3 = arith.constant 0 : index
    %c0_4 = arith.constant 0 : index
    %8 = vector.load %arg4[%c0_3, %c0_4] : memref<16x128xf32, #tpu.memory_space<vmem>>, vector<16x128xf32>
    tpu.vector_store %arg4[%c0_3, %c0_4], %7 {strides = array<i32>} : memref<16x128xf32, #tpu.memory_space<vmem>>, vector<16x128xf32>,
    %cst_5 = arith.constant dense<0xFF800000> : vector<16xf32>
    %9 = vector.multi_reduction <maximumf>, %7, %cst_5 [1] : vector<16x128xf32> to vector<16xf32>
    %10 = vector.shape_cast %9 : vector<16xf32> to vector<16x1xf32>
    %11 = vector.broadcast %10 : vector<16x1xf32> to vector<16x128xf32>
    %12 = arith.subf %7, %11 : vector<16x128xf32>
    %13 = math.exp %12 : vector<16x128xf32>
    %cst_6 = arith.constant dense<0.000000e+00> : vector<16xf32>
    %14 = vector.multi_reduction <add>, %13, %cst_6 [1] : vector<16x128xf32> to vector<16xf32>
    %15 = vector.shape_cast %14 : vector<16xf32> to vector<16x1xf32>
    %16 = math.log %15 : vector<16x1xf32>
    %17 = arith.addf %10, %16 : vector<16x1xf32>
    %c0_7 = arith.constant 0 : index
    %c0_8 = arith.constant 0 : index
    %18 = vector.load %arg2[%c0_7, %c0_8] : memref<16x1xi32, #tpu.memory_space<vmem>>, vector<16x1xi32>
    %19 = vector.broadcast %18 : vector<16x1xi32> to vector<16x128xi32>
    %20 = arith.cmpi eq, %0, %19 : vector<16x128xi32>
    %cst_9 = arith.constant 0.000000e+00 : f32
    %21 = vector.broadcast %cst_9 : f32 to vector<16x128xf32>
    %22 = arith.select %20, %7, %21 : vector<16x128xi1>, vector<16x128xf32>
    %cst_10 = arith.constant dense<0.000000e+00> : vector<16xf32>
    %23 = vector.multi_reduction <add>, %22, %cst_10 [1] : vector<16x128xf32> to vector<16xf32>
    %24 = vector.shape_cast %23 : vector<16xf32> to vector<16x1xf32>
    %c16_i32 = arith.constant 16 : i32
    %25 = arith.muli %arg0, %c16_i32 : i32
    %26 = tpu.iota {dimensions = array<i32: 0>} : vector<16x1xi32>
    %27 = vector.broadcast %25 : i32 to vector<16x1xi32>
    %28 = arith.addi %27, %26 : vector<16x1xi32>
    %c16_i32_11 = arith.constant 16 : i32
    %29 = vector.broadcast %c16_i32_11 : i32 to vector<16x1xi32>
    %30 = arith.cmpi slt, %28, %29 : vector<16x1xi32>
    %31 = arith.subf %17, %24 : vector<16x1xf32>
    %cst_12 = arith.constant 0.000000e+00 : f32
    %32 = vector.broadcast %cst_12 : f32 to vector<16x1xf32>
    %33 = arith.select %30, %31, %32 : vector<16x1xi1>, vector<16x1xf32>
    %cst_13 = arith.constant dense<0.000000e+00> : vector<1xf32>
    %34 = vector.multi_reduction <add>, %33, %cst_13 [0] : vector<16x1xf32> to vector<1xf32>
    %35 = vector.shape_cast %34 : vector<1xf32> to vector<1x1xf32>
    %36 = vector.shape_cast %35 : vector<1x1xf32> to vector<1x1x1xf32>
    %c0_14 = arith.constant 0 : index
    %c0_15 = arith.constant 0 : index
    %c0_16 = arith.constant 0 : index
    %37 = vector.load %arg5[%c0_14, %c0_15, %c0_16] : memref<1x1x1xf32, #tpu.memory_space<vmem>>, vector<1x1x1xf32>
    tpu.vector_store %arg5[%c0_14, %c0_15, %c0_16], %36 {strides = array<i32>} : memref<1x1x1xf32, #tpu.memory_space<vmem>>, vector<1x1x1xf32>,
    return
  }
  func.func @transform_0(%arg0: i32) -> (i32, i32) {
    %c0_i32 = arith.constant 0 : i32
    %c0_i32_0 = arith.constant 0 : i32
    return %arg0, %c0_i32 : i32, i32
  }
  func.func @transform_1(%arg0: i32) -> (i32, i32) {
    %c0_i32 = arith.constant 0 : i32
    %c0_i32_0 = arith.constant 0 : i32
    return %arg0, %c0_i32 : i32, i32
  }
  func.func @transform_2(%arg0: i32) -> (i32, i32) {
    %c0_i32 = arith.constant 0 : i32
    %c0_i32_0 = arith.constant 0 : i32
    %c0_i32_1 = arith.constant 0 : i32
    return %c0_i32, %c0_i32_0 : i32, i32
  }
  func.func @transform_3(%arg0: i32) -> (i32, i32) {
    %c0_i32 = arith.constant 0 : i32
    %c0_i32_0 = arith.constant 0 : i32
    return %arg0, %c0_i32 : i32, i32
  }
  func.func @transform_4(%arg0: i32) -> (i32, i32, i32) {
    %c0_i32 = arith.constant 0 : i32
    %c0_i32_0 = arith.constant 0 : i32
    %c0_i32_1 = arith.constant 0 : i32
    return %arg0, %c0_i32, %c0_i32_0 : i32, i32, i32
  }
}

</mosaic_0001>

<bundles_post_ra>
// kernel: tpu_custom_call.1
= control target key start
LH: loop header
LB: loop body
LE: loop exit
PB: predicated region body
PF: predicated region fallthrough
CT: control target
= control target key end

     0   :  { %10 = vsyncpa [#allocation3], 0  ;;  %s429_s0 = inlined_call_operand.vmem [shape: s32[16,1], index: 0, kind: input, shape index: {}]   ;;  %s430_s1 = inlined_call_operand.vmem [shape: s32[16,1], index: 1, kind: input, shape index: {}]   ;;  %s431_s2 = inlined_call_operand.hbm [shape: f32[128,128], index: 2, kind: input, shape index: {}]   ;;  %s432_s3 = inlined_call_operand.hbm [shape: f32[16,128], index: 3, kind: output, shape index: {0}]   ;;  %s433_s4 = inlined_call_operand.hbm [shape: f32[1,1,1], index: 4, kind: output, shape index: {1}]  }
   0x1   :  { %11 = vsyncpa [#allocation4], 0 }
   0x2   :  { %12 = vsyncpa [#allocation7], 0  ;;  %s370_s15 = smov [#allocation2]  }
   0x3   :  { %s22_s16 = sshll.u32 %s370_s15, 4  ;;  %s23_s16 = int_to_ptr.vmem [resolvable:$true] %s22_s16 }
   0x4   :  { %s312_s17 = scalar_lea.vmem %s23_s16, 2048  ;;  %p317_p1 = scmp.lt.s32.totalorder %s23_s16, %s23_s16 }
   0x5   :  { %p313_p0 = scmp.ne.s32.totalorder %s23_s16, %s312_s17  ;;  %p318_p2 = scmp.lt.s32.totalorder %s312_s17, %s312_s17 }
   0x7   :  { %p319_p3 = por %p318_p2, %p317_p1 }
   0x9   :  { %p320_p4 = pnand %p319_p3, %p313_p0 }
   0xb   :  { %323 = shalt.err (!%p320_p4)
}
   0xc   :  { %s371_s18 = smov 128   ;;  %s372_s19 = smov 8  }
   0xd   :  { %28 = dma.hbm_to_vmem [thread:$0]  %s431_s2, 2048, %s23_s16, [#allocation3], %s371_s18, %s371_s18, %s372_s19  }
   0xe   :  { %364 = dma.done.wait [#allocation3], 2048  }
   0xf   :  { %365 = vsyncadd [#allocation3], 4294965248  ;;  %v373_v0 = vmov 0   ;;  %v34_v1 = vld [vmem:[%s429_s0] sm:$0xff]  ;;  %v63_v2 = vld [vmem:[#allocation2 + $0x78] sm:$0xff]  ;;  %v32_v20 = vlaneseq  ;;  %v374_v23 = vmov 1.0  }
  0x10   :  { %294 = vset.pattern.permute.xlu0 %v373_v0  ;;  %295 = vset.pattern.permute.xlu1 %v373_v0  ;;  %v62_v3 = vld [vmem:[#allocation2 + $0x70] sm:$0xff]  ;;  %v35_v4 = vld [vmem:[%s429_s0 + $0x8] sm:$0xff]  ;;  %v60_v6 = vld [vmem:[#allocation2 + $0x60] sm:$0xff] }
  0x11   :  { %37 = vperm.xlu0 %294, %v34_v1   ;;  %252 = vmatprep.subr.mxu0 %v63_v2  ;;  %v61_v5 = vld [vmem:[#allocation2 + $0x68] sm:$0xff]  ;;  %v161_v7 = vld [vmem:[%s430_s1] sm:$0xff]  ;;  %v59_v8 = vld [vmem:[#allocation2 + $0x58] sm:$0xff]  ;;  %v33_v21 = vand.u32 127, %v32_v20 }
  0x12   :  { %253 = vmatpush3.msra.mxu0 %v63_v2  ;;  %v58_v9 = vld [vmem:[#allocation2 + $0x50] sm:$0xff]  ;;  %v57_v10 = vld [vmem:[#allocation2 + $0x48] sm:$0xff]  ;;  %v56_v11 = vld [vmem:[#allocation2 + $0x40] sm:$0xff] }
  0x13   :  { %254 = vmatprep.subr.mxu0 %v62_v3  ;;  %v55_v12 = vld [vmem:[#allocation2 + $0x38] sm:$0xff]  ;;  %v54_v13 = vld [vmem:[#allocation2 + $0x30] sm:$0xff]  ;;  %v53_v14 = vld [vmem:[#allocation2 + $0x28] sm:$0xff] }
  0x14   :  { %255 = vmatpush3.msra.mxu0 %v62_v3  ;;  %v52_v15 = vld [vmem:[#allocation2 + $0x20] sm:$0xff]  ;;  %v51_v16 = vld [vmem:[#allocation2 + $0x18] sm:$0xff]  ;;  %v50_v17 = vld [vmem:[#allocation2 + $0x10] sm:$0xff] }
  0x15   :  { %40 = vperm.xlu0 %294, %v35_v4   ;;  %256 = vmatprep.subr.mxu0 %v61_v5  ;;  %v49_v18 = vld [vmem:[#allocation2 + $0x8] sm:$0xff]  ;;  %v48_v19 = vld [vmem:[#allocation2] sm:$0xff] }
  0x16   :  { %257 = vmatpush3.msra.mxu0 %v61_v5  ;;  %v162_v27 = vld [vmem:[%s430_s1 + $0x8] sm:$0xff]  ;;  %s375_s1 = smov [#allocation5]  }
  0x17   :  { %258 = vmatprep.subr.mxu0 %v60_v6  ;;  %s204_s28 = sshll.u32 %s375_s1, 4  ;;  %s205_s28 = int_to_ptr.vmem [resolvable:$true] %s204_s28 }
  0x18   :  { %259 = vmatpush3.msra.mxu0 %v60_v6  ;;  %s324_s29 = scalar_lea.vmem %s205_s28, 256  ;;  %p329_p6 = scmp.lt.s32.totalorder %s205_s28, %s205_s28 }
  0x19   :  { %164 = vperm.xlu0 %294, %v161_v7   ;;  %260 = vmatprep.subr.mxu0 %v59_v8  ;;  %p325_p5 = scmp.ne.s32.totalorder %s205_s28, %s324_s29  ;;  %p330_p7 = scmp.lt.s32.totalorder %s324_s29, %s324_s29 }
  0x1a   :  { %261 = vmatpush3.msra.mxu0 %v59_v8 }
  0x1b   :  { %262 = vmatprep.subr.mxu0 %v58_v9  ;;  %p331_p8 = por %p330_p7, %p329_p6 }
  0x1c   :  { %263 = vmatpush3.msra.mxu0 %v58_v9 }
  0x1d   :  { %264 = vmatprep.subr.mxu0 %v57_v10  ;;  %p332_p9 = pnand %p331_p8, %p325_p5 }
  0x1e   :  { %265 = vmatpush3.msra.mxu0 %v57_v10 }
  0x1f   :  { %266 = vmatprep.subr.mxu0 %v56_v11 }
  0x20   :  { %267 = vmatpush3.msra.mxu0 %v56_v11 }
  0x21   :  { %268 = vmatprep.subr.mxu0 %v55_v12 }
  0x22   :  { %269 = vmatpush3.msra.mxu0 %v55_v12 }
  0x23   :  { %270 = vmatprep.subr.mxu0 %v54_v13 }
  0x24   :  { %271 = vmatpush3.msra.mxu0 %v54_v13 }
  0x25   :  { %272 = vmatprep.subr.mxu0 %v53_v14 }
  0x26   :  { %273 = vmatpush3.msra.mxu0 %v53_v14 }
  0x27   :  { %274 = vmatprep.subr.mxu0 %v52_v15 }
  0x28   :  { %275 = vmatpush3.msra.mxu0 %v52_v15 }
  0x29   :  { %276 = vmatprep.subr.mxu0 %v51_v16 }
  0x2a   :  { %277 = vmatpush3.msra.mxu0 %v51_v16 }
  0x2b   :  { %278 = vmatprep.subr.mxu0 %v50_v17 }
  0x2c   :  { %279 = vmatpush3.msra.mxu0 %v50_v17 }
  0x2d   :  { %280 = vmatprep.subr.mxu0 %v49_v18 }
  0x2e   :  { %281 = vmatpush3.msra.mxu0 %v49_v18 }
  0x2f   :  { %282 = vmatprep.subr.mxu0 %v48_v19 }
  0x30   :  { %283 = vmatpush3.msra.mxu0 %v48_v19 }
  0x8c   :  { %v38_v22 = vpop.permute.xlu0 %37 }
  0x8d   :  { %vm42_vm0 = vcmp.eq.s32.totalorder %v33_v21, %v38_v22 }
  0x8e   :  { %284 = vmatprep.mubr.msk.f32.mxu0 %vm42_vm0, %v374_v23 }
  0x90   :  { %v41_v24 = vpop.permute.xlu0 %40 }
  0x91   :  { %vm43_vm1 = vcmp.eq.s32.totalorder %v33_v21, %v41_v24 }
  0x92   :  { %285 = vmatmul.mubr.msk.f32.vlgmr.msra.gmra.mxu0 %vm43_vm1, %v374_v23 }
  0x94   :  { %v165_v35 = vpop.permute.xlu0 %164 }
  0x95   :  { %vm169_vm2 = vcmp.eq.s32.totalorder %v33_v21, %v165_v35 }
 0x152   :  { %v286_v25 = vpop.f32.mrf.mxu0 }
 0x153   :  { %140 = vst [vmem:[#allocation5 + $0x8] sm:$0xff] %v286_v25 }
 0x154   :  { %v130_v26 = vpop.f32.mrf.mxu0 }
 0x155   :  { %139 = vst [vmem:[#allocation5] sm:$0xff] %v130_v26  ;;  %141 = vmax.xlane.f32.xlu1 %v130_v26  ;;  %v171_v38 = vsel %vm169_vm2, %v130_v26, 0.0 }
 0x159   :  { %143 = vmax.xlane.f32.xlu1 %v286_v25 }
 0x16a   :  { %167 = vperm.xlu1 %295, %v162_v27  }
 0x1de   :  { %v142_v28 = vpop.xlane.xlu1 %141 }
 0x1df   :  { %v145_v29 = vsub.f32 %v130_v26, %v142_v28 }
 0x1e1   :  { %v147_v30 = vmul.f32 1.442695, %v145_v29 }
 0x1e2   :  { %v144_v31 = vpop.xlane.xlu1 %143 }
 0x1e3   :  { %296 = vpow2.f32 %v147_v30  ;;  %v146_v32 = vsub.f32 %v286_v25, %v144_v31 }
 0x1e5   :  { %v149_v33 = vmul.f32 1.442695, %v146_v32 }
 0x1e6   :  { %v168_v36 = vpop.permute.xlu1 %167 }
 0x1e7   :  { %298 = vpow2.f32 %v149_v33  ;;  %vm170_vm3 = vcmp.eq.s32.totalorder %v33_v21, %v168_v36 }
 0x1e8   :  { %v172_v39 = vsel %vm170_vm3, %v286_v25, 0.0 }
 0x1f0   :  { %v297_v34 = vpop.eup %296 }
 0x1f1   :  { %151 = vadd.xlane.f32.xlu0 %v297_v34 }
 0x1f4   :  { %v299_v37 = vpop.eup %298 }
 0x1f5   :  { %153 = vadd.xlane.f32.xlu1 %v299_v37  ;;  %173 = vadd.xlane.f32.xlu0 %v171_v38 }
 0x1f9   :  { %175 = vadd.xlane.f32.xlu0 %v172_v39 }
 0x1fa   :  { %335 = shalt.err (!%p332_p9)
}
 0x1fb   :  { %210 = dma.vmem_to_hbm [thread:$0]  %s205_s28, 256, %s432_s3, [#allocation4], %s371_s18, %s371_s18, %s372_s19   ;;  %vm197_vm4 = vcmask 0  }
 0x1fc   :  { %s376_s3 = smov [#allocation6]  }
 0x1fd   :  { %s217_s6 = sshll.u32 %s376_s3, 4  ;;  %s218_s6 = int_to_ptr.vmem [resolvable:$true] %s217_s6 }
 0x1fe   :  { %s344_s7 = scalar_lea.vmem %s218_s6, 16  ;;  %s348_s8 = scalar_lea.vmem %s218_s6, 32 }
 0x1ff   :  { %p345_p10 = scmp.ne.s32.totalorder %s218_s6, %s344_s7  ;;  %p349_p11 = scmp.lt.s32.totalorder %s218_s6, %s218_s6 }
 0x200   :  { %p350_p12 = scmp.lt.s32.totalorder %s348_s8, %s344_s7 }
 0x202   :  { %p351_p13 = por %p350_p12, %p349_p11 }
 0x204   :  { %p352_p0 = pnand %p351_p13, %p345_p10 }
 0x27a   :  { %v152_v40 = vpop.xlane.xlu0 %151 }
 0x27b   :  { %300 = vlog2.f32 %v152_v40 }
 0x27e   :  { %v154_v41 = vpop.xlane.xlu1 %153  ;;  %v174_v44 = vpop.xlane.xlu0 %173 }
 0x27f   :  { %302 = vlog2.f32 %v154_v41 }
 0x282   :  { %v176_v49 = vpop.xlane.xlu0 %175 }
 0x288   :  { %v301_v42 = vpop.eup %300 }
 0x289   :  { %v156_v43 = vmul.f32 0.6931472, %v301_v42 }
 0x28b   :  { %v159_v47 = vadd.f32 %v156_v43, %v142_v28 }
 0x28c   :  { %v303_v45 = vpop.eup %302 }
 0x28d   :  { %v158_v46 = vmul.f32 0.6931472, %v303_v45  ;;  %v186_v50 = vsub.f32 %v159_v47, %v174_v44 }
 0x28f   :  { %v160_v48 = vadd.f32 %v158_v46, %v144_v31 }
 0x291   :  { %v187_v51 = vsub.f32 %v160_v48, %v176_v49 }
 0x293   :  { %v190_v52 = vadd.f32 %v187_v51, %v186_v50 }
 0x295   :  { %v191_v53 = vrot.slane %v190_v52, 4 }
 0x297   :  { %v192_v54 = vadd.f32 %v191_v53, %v190_v52 }
 0x299   :  { %v193_v55 = vrot.slane %v192_v54, 2 }
 0x29b   :  { %v194_v56 = vadd.f32 %v193_v55, %v192_v54 }
 0x29d   :  { %v195_v57 = vrot.slane %v194_v56, 1 }
 0x29f   :  { %v196_v58 = vadd.f32 %v195_v57, %v194_v56 }
 0x2a1   :  { %198 = vst.msk [vmem:[#allocation6] sm:$0x1] %vm197_vm4, %v196_v58 }
 0x2a2   :  { %355 = shalt.err (!%p352_p0)
}
 0x2a3   :  { %220 = dma.vmem_to_hbm [thread:$0]  %s218_s6, 16, %s433_s4, [#allocation7]  }
 0x2a4   :  { %366 = dma.done.wait [#allocation4], 256  }
 0x2a5   :  { %367 = vsyncadd [#allocation4], 4294967040 }
 0x2a6   :  { %368 = dma.done.wait [#allocation7], 16  }
 0x2a7   :  { %369 = vsyncadd [#allocation7], 4294967280 }
 0x2a8   :  { %227 = vsyncpa [#allocation3], 1 }
 0x2a9   :  { %228 = vsyncpa [#allocation4], 1 }
 0x2aa   :  { %229 = vsyncpa [#allocation7], 1 }

</bundles_post_ra>
